<compile_context>
chip_gen: v7x
topology: tpu7x:2x2x1
jax: 0.10.0
libtpu: 0.0.40
codegen_flags: <defaults>
</compile_context>

<pallas_src>
import functools

import jax
import jax.numpy as jnp
from jax.experimental import pallas as pl
from jax.experimental.pallas import tpu as pltpu


# ---------------------------------------------------------------------------
# Fused attention kernel (one batch tile per grid step)
# ---------------------------------------------------------------------------
def _attention_kernel(*refs, has_mask, pack, compute_dtype, approx_recip):
    if has_mask:
        hidden_ref, enc_ref, wh_ref, we_ref, b_ref, v_ref, mask_ref = refs[:7]
        out_refs = refs[7:]
    else:
        hidden_ref, enc_ref, wh_ref, we_ref, b_ref, v_ref = refs[:6]
        mask_ref = None
        out_refs = refs[6:]

    enc = enc_ref[...]                                     # (TB, S, E) f32
    TB, S, E = enc.shape

    # Linear(2E -> E) over cat([hidden_rep, enc], dim=2), expressed as two
    # matmuls against the pre-transposed weight halves.  MXU operands are cast
    # to the compute dtype (bf16 by default); accumulation stays f32.
    wh_t = wh_ref[...].astype(compute_dtype)               # (E, E)
    we_t = we_ref[...].astype(compute_dtype)               # (E, E)
    hidden_c = hidden_ref[...].astype(compute_dtype)       # (TB, E)
    enc_c = enc.astype(compute_dtype)                      # (TB, S, E)

    h_proj = jnp.dot(hidden_c, wh_t,
                     preferred_element_type=jnp.float32)   # (TB, E) f32
    # With S a multiple of 8 this reshape is sublane-concatenation only
    # (layout preserving), so no VMEM relayout copy is materialized.
    e_proj = jnp.dot(enc_c.reshape(TB * S, E), we_t,
                     preferred_element_type=jnp.float32).reshape(TB, S, E)

    # Fold the bias into the small (TB, E) tensor before the big broadcast:
    # saves S x the bias adds on the VALU.
    hb = h_proj + b_ref[...]                               # (TB, E) f32
    energy = jnp.tanh(hb[:, None, :] + e_proj)             # (TB, S, E) f32

    # v-projection as a lane reduce: keeps scores in the natural (TB, S) layout
    # (an MXU matvec would need a sublane->lane relayout of the result).
    v = v_ref[...].reshape(1, 1, E)                        # (1, 1, E) f32
    scores = jnp.sum(energy * v, axis=2)                   # (TB, S) f32

    # Softmax over the sequence axis.  The divide is a reciprocal-multiply; in
    # the bf16 path it uses the EUP approximate reciprocal (co-issues with VALU).
    m = jnp.max(scores, axis=1, keepdims=True)
    p = jnp.exp(scores - m)
    denom = jnp.sum(p, axis=1, keepdims=True)
    attn = p * pl.reciprocal(denom, approx=approx_recip)   # (TB, S) f32

    if has_mask:
        # torch semantics: masked_fill AFTER softmax, no renormalization; the
        # masked (-1e10) weights feed the context bmm below, matching torch.
        attn = jnp.where(mask_ref[...] == 0.0, -1e10, attn)

    # context = bmm(attn.unsqueeze(1), enc) on the MXU -> (TB, 1, E).
    ctx = jnp.einsum('bqs,bse->bqe',
                     attn[:, None, :].astype(compute_dtype), enc_c,
                     preferred_element_type=jnp.float32)[:, 0, :]   # (TB, E) f32

    if pack:
        # Small / unaligned E, S: pack both results into one lane-dense slab.
        # Built by slice-stores into the pre-zeroed out block (no concatenate
        # with a fresh zeros array).
        out_ref, = out_refs
        out_ref[...] = jnp.zeros(out_ref.shape, jnp.float32)
        out_ref[:, :E] = ctx
        out_ref[:, E:E + S] = attn
    else:
        # E and S are multiples of 128: two separate lane-dense unmasked stores.
        ctx_ref, attn_ref = out_refs
        ctx_ref[...] = ctx
        attn_ref[...] = attn


# ---------------------------------------------------------------------------
# Parameters
# ---------------------------------------------------------------------------
def init_attention_params(key, hidden_dim):
    """Torch-convention parameters for Attention(hidden_dim)."""
    k1, k2, k3 = jax.random.split(key, 3)
    lim_a = 1.0 / float(2 * hidden_dim) ** 0.5
    lim_v = 1.0 / float(hidden_dim) ** 0.5
    return {
        'attn_w': jax.random.uniform(k1, (hidden_dim, 2 * hidden_dim),
                                     jnp.float32, -lim_a, lim_a),   # nn.Linear(2H, H).weight
        'attn_b': jax.random.uniform(k2, (hidden_dim,),
                                     jnp.float32, -lim_a, lim_a),   # nn.Linear(2H, H).bias
        'v_w': jax.random.uniform(k3, (1, hidden_dim),
                                  jnp.float32, -lim_v, lim_v),      # nn.Linear(H, 1, bias=False).weight
    }


def prepare_attention_params(params):
    """One-time layout prep OUTSIDE the hot path: transpose + split the weight."""
    E = params['attn_w'].shape[0]
    w_t = jnp.asarray(params['attn_w']).T                  # (2E, E)
    return {
        'wh_t': jnp.asarray(w_t[:E, :]),                   # (E, E) hidden half, pre-transposed
        'we_t': jnp.asarray(w_t[E:, :]),                   # (E, E) encoder half, pre-transposed
        'attn_b': params['attn_b'].reshape(1, E),          # (1, E)
        'v_w': jnp.asarray(params['v_w']),                  # (1, E)
    }


# ---------------------------------------------------------------------------
# Wrapper
# ---------------------------------------------------------------------------
def _choose_batch_tile(B, S, E):
    """Largest batch tile that keeps the per-step VMEM working set modest and
    respects the (8, 128) sublane constraint on the 2-D operands."""
    per_row = 6 * 4 * S * E + 32 * (S + E) + 1      # enc tile + temps + dbl-buffer (rough)
    tb = int(max(1, (24 << 20) // per_row))
    tb = min(tb, B)
    tb8 = (tb // 8) * 8
    if tb8 >= 8 and B % tb8 == 0:
        return tb8
    return B   # block == full batch dim is always layout-legal


@functools.partial(jax.jit, static_argnames=("compute_dtype", "block_b"))
def attention_forward(prepared, hidden, encoder_outputs, mask=None, *,
                      compute_dtype=jnp.bfloat16, block_b=None):
    """hidden: (1, B, E) (single-layer GRU hidden), encoder_outputs: (B, S, E),
    mask: optional (B, S).  Returns (context (B, 1, E), attn_weights (B, S))."""
    B, S, E = encoder_outputs.shape
    # torch: hidden.transpose(0, 1).repeat(1, S, 1); with L == 1 this is hidden[0].
    hidden2d = hidden.reshape(B, E)
    has_mask = mask is not None

    if block_b is None:
        tb = _choose_batch_tile(B, S, E)
    else:
        tb = int(block_b)
        if B % tb != 0 or not (tb == B or tb % 8 == 0):
            tb = B
    grid = (B // tb,)

    idx_b = lambda i: (i, 0)
    idx_b3 = lambda i: (i, 0, 0)
    idx_fix = lambda i: (0, 0)       # weights: constant block index -> fetched once

    in_specs = [
        pl.BlockSpec((tb, E), idx_b),        # hidden tile
        pl.BlockSpec((tb, S, E), idx_b3),    # encoder tile (double-buffered)
        pl.BlockSpec((E, E), idx_fix),       # wh_t
        pl.BlockSpec((E, E), idx_fix),       # we_t
        pl.BlockSpec((1, E), idx_fix),       # bias
        pl.BlockSpec((1, E), idx_fix),       # v
    ]
    args = [hidden2d, encoder_outputs, prepared['wh_t'], prepared['we_t'],
            prepared['attn_b'], prepared['v_w']]
    if has_mask:
        in_specs.append(pl.BlockSpec((tb, S), idx_b))
        args.append(mask.astype(jnp.float32))

    # Epilogue specialization: lane-dense separate outputs when aligned,
    # one packed lane-dense slab otherwise.
    pack = (E % 128 != 0) or (S % 128 != 0)
    if pack:
        out_lanes = 128 * pl.cdiv(E + S, 128)
        out_shape = jax.ShapeDtypeStruct((B, out_lanes), jnp.float32)
        out_specs = pl.BlockSpec((tb, out_lanes), idx_b)
        out_cols = out_lanes
    else:
        out_shape = (jax.ShapeDtypeStruct((B, E), jnp.float32),
                     jax.ShapeDtypeStruct((B, S), jnp.float32))
        out_specs = (pl.BlockSpec((tb, E), idx_b),
                     pl.BlockSpec((tb, S), idx_b))
        out_cols = E + S

    # Advisory cost estimate so XLA can overlap the call with surrounding ops.
    cost = pl.CostEstimate(
        flops=int(2 * B * S * E * E + 2 * B * E * E + 6 * B * S * E),
        transcendentals=int(B * S * E + B * S + B),
        bytes_accessed=int(4 * (B * E + B * S * E + 2 * E * E + 2 * E
                                + B * out_cols + (B * S if has_mask else 0))))

    # Explicit VMEM budget: enc tile double-buffered + f32/bf16 temporaries,
    # clamped so it stays safe on v7x (64 MiB physical) and v5e (16 MiB scoped).
    enc_tile_bytes = 4 * tb * S * E
    vmem_limit = int(min(max(8 * enc_tile_bytes + (4 << 20), 32 << 20), 48 << 20))

    kern = functools.partial(
        _attention_kernel, has_mask=has_mask, pack=pack,
        compute_dtype=compute_dtype,
        approx_recip=(compute_dtype != jnp.float32))

    result = pl.pallas_call(
        kern,
        out_shape=out_shape,
        grid_spec=pltpu.PrefetchScalarGridSpec(
            num_scalar_prefetch=0, grid=grid,
            in_specs=in_specs, out_specs=out_specs),
        compiler_params=pltpu.CompilerParams(
            dimension_semantics=("parallel",),
            vmem_limit_bytes=vmem_limit),
        cost_estimate=cost,
    )(*args)

    if pack:
        context = result[:, :E].reshape(B, 1, E)
        attn_weights = result[:, E:E + S]
    else:
        ctx2d, attn_weights = result
        context = ctx2d.reshape(B, 1, E)
    return context, attn_weights


# ---------------------------------------------------------------------------
# Pure-JAX reference (mirrors the torch forward exactly, f32)
# ---------------------------------------------------------------------------
def attention_reference(params, hidden, encoder_outputs, mask=None):
    B, S, E = encoder_outputs.shape
    h_rep = jnp.broadcast_to(jnp.transpose(hidden, (1, 0, 2)), (B, S, E))
    cat = jnp.concatenate([h_rep, encoder_outputs], axis=2)
    energy = jnp.tanh(cat @ params['attn_w'].T + params['attn_b'])
    scores = jnp.squeeze(energy @ params['v_w'].T, axis=2)
    attn = jax.nn.softmax(scores, axis=1)
    if mask is not None:
        attn = jnp.where(mask == 0, -1e10, attn)
    context = jnp.einsum('bs,bse->be', attn, encoder_outputs)[:, None, :]
    return context, attn


def _assert_close(got, want, name, rtol):
    got = jnp.asarray(got, jnp.float32)
    want = jnp.asarray(want, jnp.float32)
    err = float(jnp.max(jnp.abs(got - want)))
    tol = rtol * float(jnp.max(jnp.abs(want))) + rtol
    assert err <= tol, f"{name}: max abs err {err} > tol {tol}"


# ---------------------------------------------------------------------------
# main
# ---------------------------------------------------------------------------
if __name__ == "__main__":
    root_key = jax.random.PRNGKey(0)

    def run_case(B, S, E, block_b=None):
        case_key = jax.random.fold_in(root_key, B * 100000 + S * 1000 + E)
        kp, kh, ke, km = jax.random.split(case_key, 4)
        params = init_attention_params(kp, E)
        prepared = prepare_attention_params(params)

        hidden = jax.random.normal(kh, (1, B, E), dtype=jnp.float32)
        enc = jax.random.normal(ke, (B, S, E), dtype=jnp.float32)
        mask = (jax.random.uniform(km, (B, S)) > 0.25).astype(jnp.float32)

        ctx_r, attn_r = attention_reference(params, hidden, enc)
        ctx_mr, attn_mr = attention_reference(params, hidden, enc, mask)

        # f32 path: tight check against the torch-faithful reference.
        ctx, attn = attention_forward(prepared, hidden, enc,
                                      compute_dtype=jnp.float32, block_b=block_b)
        jax.block_until_ready((ctx, attn))
        assert ctx.shape == (B, 1, E) and attn.shape == (B, S)
        _assert_close(ctx, ctx_r, f"context f32 B{B} S{S} E{E}", 1e-4)
        _assert_close(attn, attn_r, f"attn    f32 B{B} S{S} E{E}", 1e-4)

        # bf16-MXU path (default): matmul operands bf16, rest f32.
        ctx_b, attn_b = attention_forward(prepared, hidden, enc, block_b=block_b)
        jax.block_until_ready((ctx_b, attn_b))
        _assert_close(ctx_b, ctx_r, f"context bf16 B{B} S{S} E{E}", 2e-2)
        _assert_close(attn_b, attn_r, f"attn    bf16 B{B} S{S} E{E}", 2e-2)

        # Masked path (masked_fill AFTER softmax, no renormalization).
        ctx_m, attn_m = attention_forward(prepared, hidden, enc, mask,
                                          compute_dtype=jnp.float32, block_b=block_b)
        jax.block_until_ready((ctx_m, attn_m))
        _assert_close(ctx_m, ctx_mr, f"context mask B{B} S{S} E{E}", 1e-4)
        _assert_close(attn_m, attn_mr, f"attn    mask B{B} S{S} E{E}", 1e-4)

    # Small shape implied by the module spec: packed-slab epilogue, grid=(1,).
    run_case(B=2, S=8, E=32)
    # Lane-aligned shape: two lane-dense outputs, grid=(2,) pipelined over batch
    # tiles ("parallel" -> both TensorCores on v7x, double-buffered enc DMA).
    run_case(B=16, S=128, E=128, block_b=8)

    print("KERNEL_OK")
</pallas_src>

<mosaic_0001>
module attributes {stable_mosaic.version = 11 : i64} {
  func.func @_attention_kernel(%arg0: i32, %arg1: memref<2x32xf32, #tpu.memory_space<vmem>>, %arg2: memref<2x8x32xf32, #tpu.memory_space<vmem>>, %arg3: memref<32x32xf32, #tpu.memory_space<vmem>>, %arg4: memref<32x32xf32, #tpu.memory_space<vmem>>, %arg5: memref<1x32xf32, #tpu.memory_space<vmem>>, %arg6: memref<1x32xf32, #tpu.memory_space<vmem>>, %arg7: memref<2x128xf32, #tpu.memory_space<vmem>>) attributes {dimension_semantics = [#tpu.dimension_semantics<parallel>], iteration_bounds = array<i64: 1>, scalar_prefetch = 0 : i64, scratch_operands = 0 : i64, tpu.core_type = #tpu.core_type<tc>, window_params = [{transform_indices = @transform_0, window_bounds = array<i64: 2, 32>}, {transform_indices = @transform_1, window_bounds = array<i64: 2, 8, 32>}, {pipeline_mode = #tpu.pipeline_mode<synchronous>, transform_indices = @transform_2, window_bounds = array<i64: 32, 32>}, {pipeline_mode = #tpu.pipeline_mode<synchronous>, transform_indices = @transform_3, window_bounds = array<i64: 32, 32>}, {pipeline_mode = #tpu.pipeline_mode<synchronous>, transform_indices = @transform_4, window_bounds = array<i64: 1, 32>}, {pipeline_mode = #tpu.pipeline_mode<synchronous>, transform_indices = @transform_5, window_bounds = array<i64: 1, 32>}, {transform_indices = @transform_6, window_bounds = array<i64: 2, 128>}]} {
    %c0 = arith.constant 0 : index
    %c0_0 = arith.constant 0 : index
    %c0_1 = arith.constant 0 : index
    %0 = vector.load %arg2[%c0, %c0_0, %c0_1] : memref<2x8x32xf32, #tpu.memory_space<vmem>>, vector<2x8x32xf32>
    %c0_2 = arith.constant 0 : index
    %c0_3 = arith.constant 0 : index
    %1 = vector.load %arg3[%c0_2, %c0_3] : memref<32x32xf32, #tpu.memory_space<vmem>>, vector<32x32xf32>
    %c0_4 = arith.constant 0 : index
    %c0_5 = arith.constant 0 : index
    %2 = vector.load %arg4[%c0_4, %c0_5] : memref<32x32xf32, #tpu.memory_space<vmem>>, vector<32x32xf32>
    %c0_6 = arith.constant 0 : index
    %c0_7 = arith.constant 0 : index
    %3 = vector.load %arg1[%c0_6, %c0_7] : memref<2x32xf32, #tpu.memory_space<vmem>>, vector<2x32xf32>
    %cst = arith.constant dense<0.000000e+00> : vector<2x32xf32>
    %4 = tpu.matmul %3, %1, %cst {dimension_numbers = #tpu.dot_dimension_numbers<[1], [0], [0], [1], [0, 0, 1, 1], [], []>} : vector<2x32xf32>, vector<32x32xf32>, vector<2x32xf32> -> vector<2x32xf32>
    %5 = vector.shape_cast %0 : vector<2x8x32xf32> to vector<16x32xf32>
    %cst_8 = arith.constant dense<0.000000e+00> : vector<16x32xf32>
    %6 = tpu.matmul %5, %2, %cst_8 {dimension_numbers = #tpu.dot_dimension_numbers<[1], [0], [0], [1], [0, 0, 1, 1], [], []>} : vector<16x32xf32>, vector<32x32xf32>, vector<16x32xf32> -> vector<16x32xf32>
    %7 = vector.shape_cast %6 : vector<16x32xf32> to vector<2x8x32xf32>
    %c0_9 = arith.constant 0 : index
    %c0_10 = arith.constant 0 : index
    %8 = vector.load %arg5[%c0_9, %c0_10] : memref<1x32xf32, #tpu.memory_space<vmem>>, vector<1x32xf32>
    %9 = vector.broadcast %8 : vector<1x32xf32> to vector<2x32xf32>
    %10 = arith.addf %4, %9 : vector<2x32xf32>
    %11 = vector.shape_cast %10 : vector<2x32xf32> to vector<2x1x32xf32>
    %12 = vector.broadcast %11 : vector<2x1x32xf32> to vector<2x8x32xf32>
    %13 = arith.addf %12, %7 : vector<2x8x32xf32>
    %14 = math.tanh %13 : vector<2x8x32xf32>
    %c0_11 = arith.constant 0 : index
    %c0_12 = arith.constant 0 : index
    %15 = vector.load %arg6[%c0_11, %c0_12] : memref<1x32xf32, #tpu.memory_space<vmem>>, vector<1x32xf32>
    %16 = vector.shape_cast %15 : vector<1x32xf32> to vector<1x1x32xf32>
    %17 = vector.broadcast %16 : vector<1x1x32xf32> to vector<2x8x32xf32>
    %18 = arith.mulf %14, %17 : vector<2x8x32xf32>
    %cst_13 = arith.constant dense<0.000000e+00> : vector<2x8xf32>
    %19 = vector.multi_reduction <add>, %18, %cst_13 [2] : vector<2x8x32xf32> to vector<2x8xf32>
    %cst_14 = arith.constant dense<0xFF800000> : vector<2xf32>
    %20 = vector.multi_reduction <maximumf>, %19, %cst_14 [1] : vector<2x8xf32> to vector<2xf32>
    %21 = vector.shape_cast %20 : vector<2xf32> to vector<2x1xf32>
    %22 = vector.broadcast %21 : vector<2x1xf32> to vector<2x8xf32>
    %23 = arith.subf %19, %22 : vector<2x8xf32>
    %24 = math.exp %23 : vector<2x8xf32>
    %cst_15 = arith.constant dense<0.000000e+00> : vector<2xf32>
    %25 = vector.multi_reduction <add>, %24, %cst_15 [1] : vector<2x8xf32> to vector<2xf32>
    %26 = vector.shape_cast %25 : vector<2xf32> to vector<2x1xf32>
    %27 = tpu.reciprocal %26 : vector<2x1xf32> -> vector<2x1xf32>
    %28 = vector.broadcast %27 : vector<2x1xf32> to vector<2x8xf32>
    %29 = arith.mulf %24, %28 : vector<2x8xf32>
    %30 = vector.shape_cast %29 : vector<2x8xf32> to vector<2x1x8xf32>
    "tpu.trace_start"() <{level = 10 : i32, message = "bqs,bse->bqe"}> : () -> ()
    %cst_16 = arith.constant dense<0.000000e+00> : vector<2x1x32xf32>
    %31 = tpu.matmul %30, %0, %cst_16 {dimension_numbers = #tpu.dot_dimension_numbers<[2], [1], [1], [2], [0, 0, 0, 1, 1, 2], [0], [0]>} : vector<2x1x8xf32>, vector<2x8x32xf32>, vector<2x1x32xf32> -> vector<2x1x32xf32>
    "tpu.trace_stop"() : () -> ()
    %32 = vector.shape_cast %31 : vector<2x1x32xf32> to vector<2x32xf32>
    %cst_17 = arith.constant 0.000000e+00 : f32
    %33 = vector.broadcast %cst_17 : f32 to vector<2x128xf32>
    %c0_18 = arith.constant 0 : index
    %c0_19 = arith.constant 0 : index
    %34 = vector.load %arg7[%c0_18, %c0_19] : memref<2x128xf32, #tpu.memory_space<vmem>>, vector<2x128xf32>
    tpu.vector_store %arg7[%c0_18, %c0_19], %33 {strides = array<i32>} : memref<2x128xf32, #tpu.memory_space<vmem>>, vector<2x128xf32>,
    %c0_20 = arith.constant 0 : index
    %c0_21 = arith.constant 0 : index
    %35 = vector.load %arg7[%c0_20, %c0_21] : memref<2x128xf32, #tpu.memory_space<vmem>>, vector<2x32xf32>
    tpu.vector_store %arg7[%c0_20, %c0_21], %32 {strides = array<i32>} : memref<2x128xf32, #tpu.memory_space<vmem>>, vector<2x32xf32>,
    %c0_22 = arith.constant 0 : index
    %c32 = arith.constant 32 : index
    %36 = vector.load %arg7[%c0_22, %c32] : memref<2x128xf32, #tpu.memory_space<vmem>>, vector<2x8xf32>
    tpu.vector_store %arg7[%c0_22, %c32], %29 {strides = array<i32>} : memref<2x128xf32, #tpu.memory_space<vmem>>, vector<2x8xf32>,
    return
  }
  func.func @transform_0(%arg0: i32) -> (i32, i32) {
    %c0_i32 = arith.constant 0 : i32
    %c0_i32_0 = arith.constant 0 : i32
    return %arg0, %c0_i32 : i32, i32
  }
  func.func @transform_1(%arg0: i32) -> (i32, i32, i32) {
    %c0_i32 = arith.constant 0 : i32
    %c0_i32_0 = arith.constant 0 : i32
    %c0_i32_1 = arith.constant 0 : i32
    return %arg0, %c0_i32, %c0_i32_0 : i32, i32, i32
  }
  func.func @transform_2(%arg0: i32) -> (i32, i32) {
    %c0_i32 = arith.constant 0 : i32
    %c0_i32_0 = arith.constant 0 : i32
    %c0_i32_1 = arith.constant 0 : i32
    return %c0_i32, %c0_i32_0 : i32, i32
  }
  func.func @transform_3(%arg0: i32) -> (i32, i32) {
    %c0_i32 = arith.constant 0 : i32
    %c0_i32_0 = arith.constant 0 : i32
    %c0_i32_1 = arith.constant 0 : i32
    return %c0_i32, %c0_i32_0 : i32, i32
  }
  func.func @transform_4(%arg0: i32) -> (i32, i32) {
    %c0_i32 = arith.constant 0 : i32
    %c0_i32_0 = arith.constant 0 : i32
    %c0_i32_1 = arith.constant 0 : i32
    return %c0_i32, %c0_i32_0 : i32, i32
  }
  func.func @transform_5(%arg0: i32) -> (i32, i32) {
    %c0_i32 = arith.constant 0 : i32
    %c0_i32_0 = arith.constant 0 : i32
    %c0_i32_1 = arith.constant 0 : i32
    return %c0_i32, %c0_i32_0 : i32, i32
  }
  func.func @transform_6(%arg0: i32) -> (i32, i32) {
    %c0_i32 = arith.constant 0 : i32
    %c0_i32_0 = arith.constant 0 : i32
    return %arg0, %c0_i32 : i32, i32
  }
}

</mosaic_0001>

<bundles_post_ra>
// kernel: attention_forward.1
= control target key start
LH: loop header
LB: loop body
LE: loop exit
PB: predicated region body
PF: predicated region fallthrough
CT: control target
= control target key end

     0   :  { %11 = vsyncpa [#allocation3], 0  ;;  %s791_s0 = inlined_call_operand.vmem [shape: f32[2,32], index: 0, kind: input, shape index: {}]   ;;  %s792_s1 = inlined_call_operand.vmem [shape: f32[2,8,32], index: 1, kind: input, shape index: {}]   ;;  %s793_s2 = inlined_call_operand.hbm [shape: f32[32,32], index: 2, kind: input, shape index: {}]   ;;  %s794_s3 = inlined_call_operand.hbm [shape: f32[32,32], index: 3, kind: input, shape index: {}]   ;;  %s795_s4 = inlined_call_operand.vmem [shape: f32[1,32], index: 4, kind: input, shape index: {}]   ;;  %s796_s5 = inlined_call_operand.vmem [shape: f32[1,32], index: 5, kind: input, shape index: {}]   ;;  %s797_s6 = inlined_call_operand.vmem [shape: f32[2,128], index: 6, kind: output, shape index: {}]  }
   0x1   :  { %12 = vsyncpa [#allocation5], 0  ;;  %s672_s21 = smov [#allocation2]   ;;  %s624_s25 = scalar_lea.hbm %s793_s2, 512 }
   0x2   :  { %s22_s22 = sshll.u32 %s672_s21, 4  ;;  %p625_p0 = scmp.ne.s32.totalorder %s793_s2, %s624_s25  ;;  %s23_s22 = int_to_ptr.vmem [resolvable:$true] %s22_s22 }
   0x3   :  { %p628_p1 = scmp.lt.u32.totalorder %s624_s25, %s793_s2 }
   0x5   :  { %p630_p2 = pnand %p628_p1, %p625_p0 }
   0x7   :  { %633 = shalt.err (!%p630_p2)
}
   0x8   :  { %s634_s30 = scalar_lea.vmem %s23_s22, 512  ;;  %p639_p4 = scmp.lt.s32.totalorder %s23_s22, %s23_s22 }
   0x9   :  { %p635_p3 = scmp.ne.s32.totalorder %s23_s22, %s634_s30  ;;  %p640_p5 = scmp.lt.s32.totalorder %s634_s30, %s634_s30 }
   0xb   :  { %p641_p6 = por %p640_p5, %p639_p4 }
   0xd   :  { %p642_p7 = pnand %p641_p6, %p635_p3 }
   0xf   :  { %645 = shalt.err (!%p642_p7)
}
  0x10   :  { %s673_s7 = smov 128   ;;  %s674_s8 = smov 8  }
  0x11   :  { %28 = dma.hbm_to_vmem [thread:$0]  %s793_s2, 512, %s23_s22, [#allocation3], %s673_s7, %s673_s7, %s674_s8  }
  0x12   :  { %s675_s11 = smov [#allocation4]   ;;  %s646_s15 = scalar_lea.hbm %s794_s3, 512 }
  0x13   :  { %s34_s12 = sshll.u32 %s675_s11, 4  ;;  %p647_p8 = scmp.ne.s32.totalorder %s794_s3, %s646_s15  ;;  %s35_s12 = int_to_ptr.vmem [resolvable:$true] %s34_s12 }
  0x14   :  { %p650_p9 = scmp.lt.u32.totalorder %s646_s15, %s794_s3 }
  0x16   :  { %p652_p10 = pnand %p650_p9, %p647_p8 }
  0x18   :  { %655 = shalt.err (!%p652_p10)
}
  0x19   :  { %s656_s20 = scalar_lea.vmem %s35_s12, 512  ;;  %p661_p12 = scmp.lt.s32.totalorder %s35_s12, %s35_s12 }
  0x1a   :  { %p657_p11 = scmp.ne.s32.totalorder %s35_s12, %s656_s20  ;;  %p662_p13 = scmp.lt.s32.totalorder %s656_s20, %s656_s20 }
  0x1c   :  { %p663_p0 = por %p662_p13, %p661_p12 }
  0x1e   :  { %p664_p1 = pnand %p663_p0, %p657_p11 }
  0x20   :  { %667 = shalt.err (!%p664_p1)
}
  0x21   :  { %40 = dma.hbm_to_vmem [thread:$0]  %s794_s3, 512, %s35_s12, [#allocation5], %s673_s7, %s673_s7, %s674_s8  }
  0x22   :  { %668 = dma.done.wait [#allocation3], 512  }
  0x23   :  { %669 = vsyncadd [#allocation3], 4294966784 }
  0x24   :  { %670 = dma.done.wait [#allocation5], 512  }
  0x25   :  { %671 = vsyncadd [#allocation5], 4294966784  ;;  %v676_v0 = vmov 0.0|0.0   ;;  %vm677_vm0 = vmmov 0   ;;  %v678_v1 = vmov 0.0   ;;  %v53_v2 = vld [vmem:[#allocation2] sm:$0xff]  ;;  %v228_v19 = vlaneseq }
  0x26   :  { %597 = vmatprep.subr.bf16.mxu1 %v676_v0  ;;  %576 = vmatprep.mubr.msk.f32.mxu1 %vm677_vm0, %v678_v1  ;;  %508 = vst [vmem:[%s797_s6] sm:$0x3] %v678_v1  ;;  %v54_v3 = vld [vmem:[#allocation2 + $0x8] sm:$0xff]  ;;  %v55_v4 = vld [vmem:[#allocation2 + $0x10] sm:$0xff]  ;;  %v56_v6 = vld [vmem:[#allocation2 + $0x18] sm:$0xff]  ;;  %vm62_vm1 = vcmask 261120   ;;  %vm288_vm2 = vcmask 1041409  }
  0x27   :  { %v598_v5 = vpack.c.bf16 %v54_v3, %v53_v2  ;;  %v57_v7 = vld [vmem:[#allocation4] sm:$0xff]  ;;  %v58_v8 = vld [vmem:[#allocation4 + $0x8] sm:$0xff]  ;;  %v59_v10 = vld [vmem:[#allocation4 + $0x10] sm:$0xff]  ;;  %v601_v12 = vpack.c.bf16 %v56_v6, %v55_v4  ;;  %v679_v17 = vmov 1966171168   ;;  %v758_v21 = vshrl.u32 %v228_v19, 7 }
  0x28   :  { %v589_v9 = vpack.c.bf16 %v58_v8, %v57_v7  ;;  %v60_v11 = vld [vmem:[#allocation4 + $0x18] sm:$0xff]  ;;  %v51_v14 = vld [vmem:[%s792_s1] sm:$0xff]  ;;  %v52_v16 = vld [vmem:[%s792_s1 + $0x8] sm:$0xff]  ;;  %v226_v18 = vunpack.c.l.s4 %v679_v17  ;;  %v279_v45 = vand.u32 127, %v228_v19  ;;  %vm291_vm3 = vcmask 58368  }
  0x29   :  { %599 = vmatpush3.bf16.msra.mxu1 %v598_v5  ;;  %v593_v13 = vpack.c.bf16 %v60_v11, %v59_v10  ;;  %565 = vmatprep.mubr.msk.f32.mxu0 %vm62_vm1, %v51_v14  ;;  %v61_v15 = vld [vmem:[%s791_s0] sm:$0x3]  ;;  %v765_v29 = vsub.s32 0, %v758_v21  ;;  %v680_v53 = vmov 0   ;;  %v302_v54 = vsub.s32 1, %v758_v21 }
  0x2a   :  { %600 = vmatprep.subr.bf16.mxu1 %v676_v0  ;;  %590 = vmatprep.subr.bf16.mxu0 %v589_v9  ;;  %v227_v20 = vunpack.c.0.s8 %v226_v18  ;;  %v537_v22 = vld [vmem:[%s795_s4] ss:$0 sm:$0xff]  ;;  %v282_v47 = vsub.s32 %v279_v45, %v758_v21  ;;  %vm355_vm4 = vcmask 64512   ;;  %vm514_vm5 = vcmask 254976  }
  0x2b   :  { %592 = vmatpush3.bf16.msra.mxu0 %v589_v9  ;;  %v539_v38 = vld [vmem:[%s796_s5] ss:$0 sm:$0xff]  ;;  %613 = vset.pattern.permute.xlu0 %v680_v53  ;;  %vm527_vm6 = vcmask 320768  }
  0x2c   :  { %594 = vmatprep.subr.bf16.mxu0 %v593_v13  ;;  %v230_v23 = vsub.s32 %v227_v20, %v758_v21  ;;  %612 = vset.pattern.permute.xlu1 %v680_v53 }
  0x2d   :  { %602 = vmatpush3.bf16.msra.mxu1 %v601_v12  ;;  %v516_v12 = vadd.s32 4294967264, %v279_v45 }
  0x2e   :  { %584 = vmatprep.subr.mxu1 %v678_v1 }
  0x2f   :  { %596 = vmatpush3.bf16.msra.mxu0 %v593_v13 }
  0x30   :  { %577 = vmatmul.mubr.msk.f32.vlgmr.msra.gmra.mrb[0].mxu1 %vm62_vm1, %v61_v15  ;;  %579 = vmatprep.subr.mxu0 %v678_v1 }
  0x31   :  { %585 = vmatpush3.msra.mxu1 %v52_v16  ;;  %586 = vmatprep.mubr.msk.f32.mxu1 %vm677_vm0, %v678_v1 }
  0x32   :  { %566 = vmatmul.mubr.msk.f32.vlgmr.msra.gmra.mrb[0].mxu0 %vm62_vm1, %v52_v16 }
  0x33   :  { %580 = vmatpush3.msra.mxu0 %v51_v14  ;;  %581 = vmatprep.mubr.msk.f32.mxu0 %vm677_vm0, %v678_v1  ;;  %v519_v14 = vsub.s32 %v516_v12, %v758_v21 }
 0x103   :  { %v220_v24 = vpop.f32.mrb[0].mxu1 }
 0x104   :  { %v221_v25 = vadd.f32 %v537_v22, %v220_v24  ;;  %v578_v26 = vpop.f32.mrb[1].mxu1 }
 0x105   :  { %v567_v27 = vpop.f32.mrb[0].mxu0 }
 0x106   :  { %v231_v28 = vrot.slane %v221_v25, %v230_v23  ;;  %v135_v30 = vpop.f32.mrb[1].mxu0 }
 0x108   :  { %v232_v31 = vcombine.high %v231_v28, %v231_v28  ;;  %v239_v32 = vrot.slane %v231_v28, %v230_v23 }
 0x10a   :  { %v246_v33 = vrot.slane %v232_v31, %v230_v23  ;;  %v250_v34 = vrot.slane %v239_v32, %v765_v29 }
 0x10c   :  { %v254_v35 = vrot.slane %v246_v33, %v765_v29  ;;  %v257_v36 = vadd.f32 %v250_v34, %v135_v30 }
 0x10e   :  { %v258_v37 = vadd.f32 %v567_v27, %v254_v35  ;;  %614 = vtanh.f32 %v257_v36 }
 0x110   :  { %616 = vtanh.f32 %v258_v37 }
 0x118   :  { %v615_v39 = vpop.eup %614 }
 0x119   :  { %v268_v40 = vmul.f32 %v615_v39, %v539_v38 }
 0x11a   :  { %v617_v41 = vpop.eup %616 }
 0x11b   :  { %v270_v42 = vsel %vm62_vm1, %v268_v40, 0.0  ;;  %v269_v43 = vmul.f32 %v617_v41, %v539_v38 }
 0x11c   :  { %271 = vadd.xlane.f32.xlu0 %v270_v42 }
 0x11d   :  { %v273_v44 = vsel %vm62_vm1, %v269_v43, 0.0 }
 0x120   :  { %274 = vadd.xlane.f32.xlu0 %v273_v44 }
 0x1a9   :  { %v272_v46 = vpop.xlane.xlu0 %271 }
 0x1aa   :  { %v283_v49 = vrot.slane %v272_v46, %v282_v47 }
 0x1ad   :  { %v275_v48 = vpop.xlane.xlu0 %274 }
 0x1ae   :  { %v287_v50 = vrot.slane %v275_v48, %v282_v47 }
 0x1b0   :  { %v289_v51 = vsel %vm288_vm2, %v287_v50, %v283_v49 }
 0x1b1   :  { %v292_v52 = vsel %vm291_vm3, %v289_v51, -inf }
 0x1b2   :  { %293 = vmax.xlane.f32.xlu1 %v292_v52 }
 0x23f   :  { %v294_v55 = vpop.xlane.xlu1 %293 }
 0x240   :  { %v299_v56 = vrot.slane %v294_v55, %v765_v29  ;;  %v303_v57 = vrot.slane %v294_v55, %v302_v54 }
 0x242   :  { %v306_v58 = vsub.f32 %v272_v46, %v299_v56  ;;  %v307_v59 = vsub.f32 %v275_v48, %v303_v57 }
 0x244   :  { %v308_v60 = vmul.f32 1.442695, %v306_v58  ;;  %v310_v61 = vmul.f32 1.442695, %v307_v59 }
 0x246   :  { %618 = vpow2.f32 %v308_v60 }
 0x247   :  { %620 = vpow2.f32 %v310_v61 }
 0x250   :  { %v619_v62 = vpop.eup %618 }
 0x251   :  { %v621_v63 = vpop.eup %620  ;;  %315 = vperm.xlu1 %612, %v619_v62  }
 0x252   :  { %318 = vperm.xlu0 %613, %v621_v63  }
 0x2d0   :  { %v316_v0 = vpop.permute.xlu1 %315 }
 0x2d1   :  { %v319_v1 = vpop.permute.xlu0 %318  ;;  %v323_v2 = vrot.slane %v316_v0, %v282_v47 }
 0x2d2   :  { %v327_v3 = vrot.slane %v319_v1, %v282_v47 }
 0x2d4   :  { %v328_v4 = vsel %vm288_vm2, %v327_v3, %v323_v2 }
 0x2d5   :  { %v330_v5 = vsel %vm291_vm3, %v328_v4, 0.0 }
 0x2d6   :  { %331 = vadd.xlane.f32.xlu1 %v330_v5 }
 0x363   :  { %v332_v6 = vpop.xlane.xlu1 %331 }
 0x364   :  { %622 = vrcp.f32 %v332_v6 }
 0x36e   :  { %v623_v7 = vpop.eup %622 }
 0x36f   :  { %v342_v8 = vrot.slane %v623_v7, %v302_v54  ;;  %v338_v10 = vrot.slane %v623_v7, %v765_v29 }
 0x371   :  { %v346_v9 = vmul.f32 %v621_v63, %v342_v8  ;;  %v345_v11 = vmul.f32 %v619_v62, %v338_v10 }
 0x373   :  { %430 = vperm.xlu0 %613, %v346_v9  }
 0x377   :  { %349 = vperm.xlu0 %613, %v345_v11  }
 0x3f2   :  { %v431_v13 = vpop.permute.xlu0 %430 }
 0x3f3   :  { %v435_v15 = vrot.slane %v431_v13, %v282_v47  ;;  %v524_v17 = vrot.slane %v431_v13, %v519_v14 }
 0x3f5   :  { %587 = vmatmul.mubr.msk.f32.vlgmr.msra.gmra.mrb[2].mxu1 %vm355_vm4, %v435_v15 }
 0x3f6   :  { %v350_v16 = vpop.permute.xlu0 %349 }
 0x3f7   :  { %v354_v18 = vrot.slane %v350_v16, %v282_v47  ;;  %v520_v19 = vrot.slane %v350_v16, %v519_v14 }
 0x3f9   :  { %v525_v20 = vsel %vm288_vm2, %v524_v17, %v520_v19  ;;  %582 = vmatmul.mubr.msk.f32.vlgmr.msra.gmra.mrb[2].mxu0 %vm355_vm4, %v354_v18 }
 0x4c8   :  { %v504_v22 = vpop.f32.mrb[2].mxu1 }
 0x4c9   :  { %v588_v23 = vpop.f32.mrb[3].mxu1  ;;  %v511_v24 = vrot.slane %v504_v22, 7 }
 0x4cc   :  { %v424_v25 = vpop.f32.mrb[2].mxu0 }
 0x4cd   :  { %v512_v26 = vsel %vm288_vm2, %v511_v24, %v424_v25  ;;  %v583_v27 = vpop.f32.mrb[3].mxu0 }
 0x4ce   :  { %515 = vst.msk [vmem:[%s797_s6] sm:$0x3] %vm514_vm5, %v512_v26 }
 0x4cf   :  { %528 = vst.msk [vmem:[%s797_s6] sm:$0x3] %vm527_vm6, %v525_v20 }
 0x4d0   :  { %533 = vsyncpa [#allocation3], 1 }
 0x4d1   :  { %534 = vsyncpa [#allocation5], 1 }

</bundles_post_ra>
